<compile_context>
chip_gen: v7x
topology: tpu7x:2x2x1
jax: 0.10.0
libtpu: 0.0.40
codegen_flags: <defaults>
</compile_context>

<pallas_src>
import jax
import jax.numpy as jnp
import numpy as np
from jax import lax
from jax.experimental import pallas as pl
from jax.experimental.pallas import tpu as pltpu


def make_offset_subtraction_kernel(d):
    # Same delay ordering as the PyTorch module: [0, 1..d, -1..-d].
    delays = [0] + [i for i in range(1, d + 1)] + [-i for i in range(1, d + 1)]

    def kernel(subed_ref, sub_ref, o_ref):
        subed = subed_ref[...]                        # (TB, W, F)
        sub = sub_ref[...]                            # (TB, W, F)
        TB, W, F = subed.shape

        # Delay 0 initializes the running minimum (first-occurrence tie-break).
        best = subed - sub
        best_abs = jnp.abs(best)

        if d > 0:
            # ---- hoisted loop invariants (computed once per grid step) ----
            t_idx = lax.broadcasted_iota(jnp.int32, (TB, W, F), 1)
            first_rows = jnp.broadcast_to(sub[:, 0:1, :], (TB, W, F))
            last_rows = jnp.broadcast_to(sub[:, W - 1:W, :], (TB, W, F))
            diff_first = subed - first_rows           # candidate when clamped to row 0
            diff_last = subed - last_rows             # candidate when clamped to row W-1

            # Static unroll over 2d delays (d is small for this module).
            # TODO(synk): for very large d switch to lax.fori_loop with a
            # cumulative shift-by-1 carry to bound code size / vreg pressure.
            for s in delays[1:]:
                if s > 0:
                    # rolled[t] = sub[(t + s) mod W]  (XLU sublane rotate)
                    rolled = pltpu.roll(sub, (W - s) % W, axis=1)
                    # rows with t + s >= W are clamped to the last row
                    diff = jnp.where(t_idx >= W - s, diff_last, subed - rolled)
                else:
                    m = -s
                    # rolled[t] = sub[(t - m) mod W]
                    rolled = pltpu.roll(sub, m % W, axis=1)
                    # rows with t - m < 0 are clamped to the first row
                    diff = jnp.where(t_idx < m, diff_first, subed - rolled)

                a = jnp.abs(diff)
                take = a < best_abs                   # strict < keeps earliest delay on ties
                best = jnp.where(take, diff, best)
                best_abs = jnp.where(take, a, best_abs)

        o_ref[...] = best.astype(o_ref.dtype)

    return kernel


def _pick_tb(B, W, F, itemsize, target_bytes=1 << 20):
    """Batch-tile size: ~1 MiB per input block, grid >= 2 steps when B >= 2."""
    per_batch = max(1, W * F * itemsize)
    cap = max(1, target_bytes // per_batch)
    if B >= 2:
        cap = min(cap, B // 2)        # keep >= 2 grid steps so both v7x TCs get work
    cap = int(max(1, min(cap, B)))
    tb = 1
    for cand in range(1, cap + 1):    # largest divisor of B not exceeding cap
        if B % cand == 0:
            tb = cand
    return tb


def offset_subtraction(subed, sub, d):
    """subed, sub: (B, window_size, feature_num). Returns (B, window_size, feature_num)."""
    B, W, F = subed.shape
    assert sub.shape == (B, W, F)
    assert d >= 0

    itemsize = jnp.dtype(subed.dtype).itemsize
    TB = _pick_tb(B, W, F, itemsize)
    blk_bytes = TB * W * F * itemsize
    # ~6 pipelined buffers + ~14 blocks of in-kernel temporaries, with headroom.
    # Clamped so it is safe on v7x (64 MiB physical VMEM) and raises v5e's
    # 16 MiB default scoped limit when blocks grow.
    vmem_limit = int(min(56 * 1024 * 1024, max(32 * 1024 * 1024, 28 * blk_bytes)))

    return pl.pallas_call(
        make_offset_subtraction_kernel(d),
        out_shape=jax.ShapeDtypeStruct((B, W, F), subed.dtype),
        grid=(B // TB,),
        in_specs=[
            pl.BlockSpec((TB, W, F), lambda i: (i, 0, 0)),
            pl.BlockSpec((TB, W, F), lambda i: (i, 0, 0)),
        ],
        out_specs=pl.BlockSpec((TB, W, F), lambda i: (i, 0, 0)),
        compiler_params=pltpu.CompilerParams(
            dimension_semantics=("parallel",),
            vmem_limit_bytes=vmem_limit,
        ),
    )(subed, sub)


# ------------------------------ pure-JAX reference ------------------------------
def ref_offset_subtraction(subed, sub, d):
    """Direct transcription of the PyTorch forward (pad -> gather -> argmin -> gather)."""
    B, W, F = subed.shape
    delays = np.array([0] + list(range(1, d + 1)) + [-i for i in range(1, d + 1)],
                      dtype=np.int32)                                   # (K,)
    # Padding with W copies of the first/last row + index (W + t + delay) is exactly
    # clamp(t + delay, 0, W-1).
    idx = np.clip(np.arange(W)[:, None] + delays[None, :], 0, W - 1)    # (W, K)
    gathered = sub[:, idx, :]                                           # (B, W, K, F)
    gathered = jnp.transpose(gathered, (0, 1, 3, 2))                    # (B, W, F, K)
    res = subed[..., None] - gathered                                   # (B, W, F, K)
    sel = jnp.argmin(jnp.abs(res), axis=-1)                             # first-occurrence min
    out = jnp.take_along_axis(res, sel[..., None], axis=-1)[..., 0]
    return out


if __name__ == "__main__":
    # Small shapes consistent with the module: batch=2, window_size=16,
    # feature_num=128 (lane-dense), d=3 -> 2*d+1 = 7 candidate delays.
    B, W, F, d = 2, 16, 128, 3

    key = jax.random.PRNGKey(0)
    k1, k2 = jax.random.split(key)
    subed = jax.random.normal(k1, (B, W, F), jnp.float32)
    sub = jax.random.normal(k2, (B, W, F), jnp.float32)

    out = offset_subtraction(subed, sub, d)
    out = jax.block_until_ready(out)

    ref = ref_offset_subtraction(subed, sub, d)
    assert out.shape == (B, W, F)
    np.testing.assert_allclose(np.asarray(out), np.asarray(ref), rtol=1e-6, atol=1e-6)
    print("KERNEL_OK")
</pallas_src>

<mosaic_0001>
module attributes {stable_mosaic.version = 11 : i64} {
  func.func @kernel(%arg0: i32, %arg1: memref<1x16x128xf32, #tpu.memory_space<vmem>>, %arg2: memref<1x16x128xf32, #tpu.memory_space<vmem>>, %arg3: memref<1x16x128xf32, #tpu.memory_space<vmem>>) attributes {dimension_semantics = [#tpu.dimension_semantics<parallel>], iteration_bounds = array<i64: 2>, scalar_prefetch = 0 : i64, scratch_operands = 0 : i64, tpu.core_type = #tpu.core_type<tc>, window_params = [{transform_indices = @transform_0, window_bounds = array<i64: 1, 16, 128>}, {transform_indices = @transform_1, window_bounds = array<i64: 1, 16, 128>}, {transform_indices = @transform_2, window_bounds = array<i64: 1, 16, 128>}]} {
    %c0 = arith.constant 0 : index
    %c0_0 = arith.constant 0 : index
    %c0_1 = arith.constant 0 : index
    %0 = vector.load %arg1[%c0, %c0_0, %c0_1] : memref<1x16x128xf32, #tpu.memory_space<vmem>>, vector<1x16x128xf32>
    %c0_2 = arith.constant 0 : index
    %c0_3 = arith.constant 0 : index
    %c0_4 = arith.constant 0 : index
    %1 = vector.load %arg2[%c0_2, %c0_3, %c0_4] : memref<1x16x128xf32, #tpu.memory_space<vmem>>, vector<1x16x128xf32>
    %2 = arith.subf %0, %1 : vector<1x16x128xf32>
    %3 = math.absf %2 : vector<1x16x128xf32>
    %4 = tpu.iota {dimensions = array<i32: 1>} : vector<1x16x128xi32>
    %5 = vector.extract_strided_slice %1 {offsets = [0, 0, 0], sizes = [1, 1, 128], strides = [1, 1, 1]} : vector<1x16x128xf32> to vector<1x1x128xf32>
    %6 = vector.shape_cast %5 : vector<1x1x128xf32> to vector<1x1x128xf32>
    %7 = vector.broadcast %6 : vector<1x1x128xf32> to vector<1x16x128xf32>
    %8 = vector.extract_strided_slice %1 {offsets = [0, 15, 0], sizes = [1, 1, 128], strides = [1, 1, 1]} : vector<1x16x128xf32> to vector<1x1x128xf32>
    %9 = vector.shape_cast %8 : vector<1x1x128xf32> to vector<1x1x128xf32>
    %10 = vector.broadcast %9 : vector<1x1x128xf32> to vector<1x16x128xf32>
    %11 = arith.subf %0, %7 : vector<1x16x128xf32>
    %12 = arith.subf %0, %10 : vector<1x16x128xf32>
    %c15_i32 = arith.constant 15 : i32
    %13 = tpu.dynamic_rotate %1 by %c15_i32 dim 1 : vector<1x16x128xf32>, i32 -> vector<1x16x128xf32>
    %c15_i32_5 = arith.constant 15 : i32
    %14 = vector.broadcast %c15_i32_5 : i32 to vector<1x16x128xi32>
    %15 = arith.cmpi sge, %4, %14 : vector<1x16x128xi32>
    %16 = arith.subf %0, %13 : vector<1x16x128xf32>
    %17 = arith.select %15, %12, %16 : vector<1x16x128xi1>, vector<1x16x128xf32>
    %18 = math.absf %17 : vector<1x16x128xf32>
    %19 = arith.cmpf olt, %18, %3 : vector<1x16x128xf32>
    %20 = arith.select %19, %17, %2 : vector<1x16x128xi1>, vector<1x16x128xf32>
    %21 = arith.select %19, %18, %3 : vector<1x16x128xi1>, vector<1x16x128xf32>
    %c14_i32 = arith.constant 14 : i32
    %22 = tpu.dynamic_rotate %1 by %c14_i32 dim 1 : vector<1x16x128xf32>, i32 -> vector<1x16x128xf32>
    %c14_i32_6 = arith.constant 14 : i32
    %23 = vector.broadcast %c14_i32_6 : i32 to vector<1x16x128xi32>
    %24 = arith.cmpi sge, %4, %23 : vector<1x16x128xi32>
    %25 = arith.subf %0, %22 : vector<1x16x128xf32>
    %26 = arith.select %24, %12, %25 : vector<1x16x128xi1>, vector<1x16x128xf32>
    %27 = math.absf %26 : vector<1x16x128xf32>
    %28 = arith.cmpf olt, %27, %21 : vector<1x16x128xf32>
    %29 = arith.select %28, %26, %20 : vector<1x16x128xi1>, vector<1x16x128xf32>
    %30 = arith.select %28, %27, %21 : vector<1x16x128xi1>, vector<1x16x128xf32>
    %c13_i32 = arith.constant 13 : i32
    %31 = tpu.dynamic_rotate %1 by %c13_i32 dim 1 : vector<1x16x128xf32>, i32 -> vector<1x16x128xf32>
    %c13_i32_7 = arith.constant 13 : i32
    %32 = vector.broadcast %c13_i32_7 : i32 to vector<1x16x128xi32>
    %33 = arith.cmpi sge, %4, %32 : vector<1x16x128xi32>
    %34 = arith.subf %0, %31 : vector<1x16x128xf32>
    %35 = arith.select %33, %12, %34 : vector<1x16x128xi1>, vector<1x16x128xf32>
    %36 = math.absf %35 : vector<1x16x128xf32>
    %37 = arith.cmpf olt, %36, %30 : vector<1x16x128xf32>
    %38 = arith.select %37, %35, %29 : vector<1x16x128xi1>, vector<1x16x128xf32>
    %39 = arith.select %37, %36, %30 : vector<1x16x128xi1>, vector<1x16x128xf32>
    %c1_i32 = arith.constant 1 : i32
    %40 = tpu.dynamic_rotate %1 by %c1_i32 dim 1 : vector<1x16x128xf32>, i32 -> vector<1x16x128xf32>
    %c1_i32_8 = arith.constant 1 : i32
    %41 = vector.broadcast %c1_i32_8 : i32 to vector<1x16x128xi32>
    %42 = arith.cmpi slt, %4, %41 : vector<1x16x128xi32>
    %43 = arith.subf %0, %40 : vector<1x16x128xf32>
    %44 = arith.select %42, %11, %43 : vector<1x16x128xi1>, vector<1x16x128xf32>
    %45 = math.absf %44 : vector<1x16x128xf32>
    %46 = arith.cmpf olt, %45, %39 : vector<1x16x128xf32>
    %47 = arith.select %46, %44, %38 : vector<1x16x128xi1>, vector<1x16x128xf32>
    %48 = arith.select %46, %45, %39 : vector<1x16x128xi1>, vector<1x16x128xf32>
    %c2_i32 = arith.constant 2 : i32
    %49 = tpu.dynamic_rotate %1 by %c2_i32 dim 1 : vector<1x16x128xf32>, i32 -> vector<1x16x128xf32>
    %c2_i32_9 = arith.constant 2 : i32
    %50 = vector.broadcast %c2_i32_9 : i32 to vector<1x16x128xi32>
    %51 = arith.cmpi slt, %4, %50 : vector<1x16x128xi32>
    %52 = arith.subf %0, %49 : vector<1x16x128xf32>
    %53 = arith.select %51, %11, %52 : vector<1x16x128xi1>, vector<1x16x128xf32>
    %54 = math.absf %53 : vector<1x16x128xf32>
    %55 = arith.cmpf olt, %54, %48 : vector<1x16x128xf32>
    %56 = arith.select %55, %53, %47 : vector<1x16x128xi1>, vector<1x16x128xf32>
    %57 = arith.select %55, %54, %48 : vector<1x16x128xi1>, vector<1x16x128xf32>
    %c3_i32 = arith.constant 3 : i32
    %58 = tpu.dynamic_rotate %1 by %c3_i32 dim 1 : vector<1x16x128xf32>, i32 -> vector<1x16x128xf32>
    %c3_i32_10 = arith.constant 3 : i32
    %59 = vector.broadcast %c3_i32_10 : i32 to vector<1x16x128xi32>
    %60 = arith.cmpi slt, %4, %59 : vector<1x16x128xi32>
    %61 = arith.subf %0, %58 : vector<1x16x128xf32>
    %62 = arith.select %60, %11, %61 : vector<1x16x128xi1>, vector<1x16x128xf32>
    %63 = math.absf %62 : vector<1x16x128xf32>
    %64 = arith.cmpf olt, %63, %57 : vector<1x16x128xf32>
    %65 = arith.select %64, %62, %56 : vector<1x16x128xi1>, vector<1x16x128xf32>
    %c0_11 = arith.constant 0 : index
    %c0_12 = arith.constant 0 : index
    %c0_13 = arith.constant 0 : index
    %66 = vector.load %arg3[%c0_11, %c0_12, %c0_13] : memref<1x16x128xf32, #tpu.memory_space<vmem>>, vector<1x16x128xf32>
    tpu.vector_store %arg3[%c0_11, %c0_12, %c0_13], %65 {strides = array<i32>} : memref<1x16x128xf32, #tpu.memory_space<vmem>>, vector<1x16x128xf32>,
    return
  }
  func.func @transform_0(%arg0: i32) -> (i32, i32, i32) {
    %c0_i32 = arith.constant 0 : i32
    %c0_i32_0 = arith.constant 0 : i32
    %c0_i32_1 = arith.constant 0 : i32
    return %arg0, %c0_i32, %c0_i32_0 : i32, i32, i32
  }
  func.func @transform_1(%arg0: i32) -> (i32, i32, i32) {
    %c0_i32 = arith.constant 0 : i32
    %c0_i32_0 = arith.constant 0 : i32
    %c0_i32_1 = arith.constant 0 : i32
    return %arg0, %c0_i32, %c0_i32_0 : i32, i32, i32
  }
  func.func @transform_2(%arg0: i32) -> (i32, i32, i32) {
    %c0_i32 = arith.constant 0 : i32
    %c0_i32_0 = arith.constant 0 : i32
    %c0_i32_1 = arith.constant 0 : i32
    return %arg0, %c0_i32, %c0_i32_0 : i32, i32, i32
  }
}

</mosaic_0001>

<bundles_post_ra>
// kernel: tpu_custom_call.1
= control target key start
LH: loop header
LB: loop body
LE: loop exit
PB: predicated region body
PF: predicated region fallthrough
CT: control target
= control target key end

     0   :  { %7 = vsyncpa [#allocation3], 0  ;;  %s990_s0 = inlined_call_operand.hbm [shape: f32[2,16,128], index: 0, kind: input, shape index: {}]   ;;  %s991_s1 = inlined_call_operand.hbm [shape: f32[2,16,128], index: 1, kind: input, shape index: {}]   ;;  %s992_s2 = inlined_call_operand.hbm [shape: f32[2,16,128], index: 2, kind: output, shape index: {}]  }
   0x1   :  { %9 = vsyncpa [#allocation3 + $0x1], 0 }
   0x2   :  { %10 = vsyncpa [#allocation6], 0 }
   0x3   :  { %12 = vsyncpa [#allocation6 + $0x1], 0 }
   0x4   :  { %13 = vsyncpa [#allocation4], 0 }
   0x5   :  { %15 = vsyncpa [#allocation4 + $0x1], 0  ;;  %s676_s9 = smov 0   ;;  %s678_s10 = smov 0  }
   0x6   :  { %s680_s11 = smov 0   ;;  %s682_s12 = smov 0  }
   0x7 LB: > { %s697_s13 = sadd.s32 4294967295, %s652_s12   ;;  %s446_s14 = sadd.s32 4294967294, %s652_s12   ;;  %s652_s12 = sphi %s682_s12, %s1008_s12   ;;  %s648_s11 = sphi %s680_s11, %s1007_s11   ;;  %s644_s10 = sphi %s678_s10, %s1006_s10   ;;  %s640_s9 = sphi %s676_s9, %s1005_s9  }
   0x8   : > { %s701_s15 = sadd.s32 1, %s652_s12   ;;  %s28_s16 = sadd.s32 1, %s648_s11 }
   0x9   : > { %s25_s17 = ssub.s32 %s652_s12, %s701_s15  ;;  %p35_p0 = scmp.ne.s32.totalorder %s648_s11, %s644_s10 }
   0xa   : > { %p26_p1 = scmp.eq.s32.totalorder %s25_s17, 0  ;;  %p36_p2 = scmp.eq.s32.totalorder %s652_s12, 0 }
   0xb   : > { %p41_p3 = scmp.ne.s32.totalorder %s644_s10, %s640_s9  ;;  %p42_p4 = scmp.eq.s32.totalorder %s697_s13, 0 }
   0xc   : > { %s713_s18 = scalar_select %p26_p1, %s648_s11, %s28_s16  }
   0xd   : > { %p715_p5 = por %p36_p2, %p35_p0  ;;  %p719_p6 = por %p42_p4, %p41_p3 }
   0xe   : > { %p91_p7 = scmp.eq.s32.totalorder %s697_s13, 1  ;;  %p97_p8 = scmp.eq.s32.totalorder %s446_s14, 1 }
   0xf   : > { %s996_s20 = scalar_select %p719_p6, 1, 0 }
  0x10   : > { %p484_p10 = scmp.lt.s32.totalorder %s652_s12, 2  ;;  %p726_p11 = por %p91_p7, %p35_p0 }
  0x11   : > { %p730_p12 = por %p97_p8, %p41_p3  ;;  %s735_s23 = sand.u32 1, %s648_s11  }
  0x12   : > { %s997_s21 = scalar_select %p726_p11, 1, 0 }
  0x13   : > { %s998_s22 = scalar_select %p730_p12, 1, 0 }
  0x14   : > { %s464_s24 = sshll.u32 %s652_s12, 8  ;;  %s449_s25 = sshll.u32 %s735_s23, 4 }
  0x15   : > { %s744_s28 = scalar_lea.hbm %s990_s0, %s464_s24  ;;  %s121_s29 = scalar_lea.vmem [#allocation2], %s449_s25 }
  0x16   : > { %s128_s30 = sshll.u32 %s121_s29, 4  ;;  %p750_p13 = pnand %p484_p10, %p715_p5  ;;  %s754_s30 = int_to_ptr.vmem [resolvable:$true] %s128_s30 }
  0x17   : > { %s118_s4 = scalar_lea.sflag [#allocation3], %s735_s23  ;;  %s522_s5 = scalar_lea.hbm %s744_s28, 256 }
  0x18   : > { %p523_p0 = scmp.ne.s32.totalorder %s744_s28, %s522_s5  ;;  %p524_p1 = pneg %p750_p13 }
  0x19   : > { %s527_s8 = scalar_lea.hbm %s990_s0, 512  ;;  %p528_p4 = scmp.lt.u32.totalorder %s744_s28, %s990_s0 }
  0x1a   : > { %p525_p2 = pnand %p524_p1, %p523_p0  ;;  %p529_p5 = scmp.lt.u32.totalorder %s527_s8, %s522_s5 }
  0x1b   : > { %p531_p8 = scmp.lt.u32.totalorder %s522_s5, %s744_s28 }
  0x1c   : > { %p526_p3 = pneg %p525_p2  ;;  %p530_p7 = por %p529_p5, %p528_p4 }
  0x1e   : > { %p532_p10 = por %p531_p8, %p530_p7 }
  0x20   : > { %p533_p9 = pnand %p532_p10, %p526_p3 }
  0x22   : > { %536 = shalt.err (!%p533_p9)
}
  0x23   : > { %s537_s17 = scalar_lea.vmem %s754_s30, 256  ;;  %s654_s19 = smov [#allocation2]  }
  0x24   : > { %p538_p0 = scmp.ne.s32.totalorder %s754_s30, %s537_s17  ;;  %s542_s26 = sshll.u32 %s654_s19, 4  ;;  %s543_s26 = int_to_ptr.vmem [resolvable:$false] %s542_s26 }
  0x25   : > { %s544_s27 = scalar_lea.vmem %s543_s26, 512  ;;  %p545_p11 = scmp.lt.s32.totalorder %s754_s30, %s543_s26 }
  0x26   : > { %p540_p2 = pnand %p538_p0, %p524_p1  ;;  %p546_p4 = scmp.lt.s32.totalorder %s544_s27, %s537_s17 }
  0x28   : > { %p541_p12 = pneg %p540_p2  ;;  %p547_p5 = por %p546_p4, %p545_p11 }
  0x2a   : > { %p548_p7 = pnand %p547_p5, %p541_p12 }
  0x2c   : > { %551 = shalt.err (!%p548_p7)
}
  0x2d   : > { %s655_s29 = smov 128   ;;  %s656_s5 = smov 8  }
  0x2e   : > { %476 = dma.hbm_to_vmem [thread:$0]  (!%p750_p13), %s744_s28, 256, %s754_s30, %s118_s4, %s655_s29, %s655_s29, %s656_s5  }
  0x2f   : > { %p455_p9 = scmp.ge.s32.totalorder %s652_s12, 1  ;;  %p157_p11 = scmp.lt.s32.totalorder %s652_s12, 3 }
  0x30   : > { %s798_s14 = scalar_lea.hbm %s991_s1, %s464_s24  ;;  %s142_s16 = scalar_lea.vmem [#allocation5], %s449_s25 }
  0x31   : > { %p789_p12 = pnand %p455_p9, %p157_p11  ;;  %s149_s17 = sshll.u32 %s142_s16, 4  ;;  %s802_s17 = int_to_ptr.vmem [resolvable:$true] %s149_s17 }
  0x32   : > { %s139_s28 = scalar_lea.sflag [#allocation6], %s735_s23  ;;  %s552_s30 = scalar_lea.hbm %s798_s14, 256 }
  0x33   : > { %p553_p3 = scmp.ne.s32.totalorder %s798_s14, %s552_s30  ;;  %s557_s24 = scalar_lea.hbm %s991_s1, 512 }
  0x34   : > { %p558_p0 = scmp.lt.u32.totalorder %s798_s14, %s991_s1  ;;  %p559_p2 = scmp.lt.u32.totalorder %s557_s24, %s552_s30 }
  0x35   : > { %p555_p8 = pnand %p553_p3, %p524_p1  ;;  %p561_p5 = scmp.lt.u32.totalorder %s552_s30, %s798_s14 }
  0x36   : > { %p560_p4 = por %p559_p2, %p558_p0 }
  0x37   : > { %p556_p10 = pneg %p555_p8 }
  0x38   : > { %p562_p7 = por %p561_p5, %p560_p4 }
  0x3a   : > { %p563_p9 = pnand %p562_p7, %p556_p10 }
  0x3c   : > { %566 = shalt.err (!%p563_p9)
}
  0x3d   : > { %s567_s25 = scalar_lea.vmem %s802_s17, 256  ;;  %s657_s7 = smov [#allocation5]  }
  0x3e   : > { %p568_p11 = scmp.ne.s32.totalorder %s802_s17, %s567_s25  ;;  %s572_s8 = sshll.u32 %s657_s7, 4  ;;  %s573_s8 = int_to_ptr.vmem [resolvable:$false] %s572_s8 }
  0x3f   : > { %s574_s16 = scalar_lea.vmem %s573_s8, 512  ;;  %p575_p6 = scmp.lt.s32.totalorder %s802_s17, %s573_s8 }
  0x40   : > { %p570_p3 = pnand %p568_p11, %p524_p1  ;;  %p576_p0 = scmp.lt.s32.totalorder %s574_s16, %s567_s25 }
  0x42   : > { %p571_p8 = pneg %p570_p3  ;;  %p577_p2 = por %p576_p0, %p575_p6 }
  0x44   : > { %p578_p4 = pnand %p577_p2, %p571_p8 }
  0x46   : > { %581 = shalt.err (!%p578_p4)
}
  0x47   : > { %479 = dma.hbm_to_vmem [thread:$0]  (!%p750_p13), %s798_s14, 256, %s802_s17, %s139_s28, %s655_s29, %s655_s29, %s656_s5  }
  0x48   : > { %161 = sbr.rel (%p789_p12) target bundleno = 132 (0x84), region = 28  ;;  %s836_s30 = sand.u32 (!%p789_p12), 1, %s644_s10  }
  0x49   : > { %s839_s4 = sshll.u32 (!%p789_p12), %s836_s30, 4  ;;  %s164_s3 = scalar_lea.sflag (!%p789_p12), [#allocation3], %s836_s30 }
  0x4a   : > { %s167_s19 = scalar_lea.vmem (!%p789_p12), [#allocation2], %s839_s4  ;;  %p1001_p6 = scmp.ne.s32.totalorder (!%p789_p12), %s996_s20, 0 }
  0x4f   : > { %627 = dma.done.wait (%p1001_p6), %s164_s3, 256  }
  0x50   : > { %629 = vsyncadd (%p1001_p6), %s164_s3, 4294967040  ;;  %s173_s23 = scalar_lea.sflag [#allocation6], %s836_s30  ;;  %s176_s29 = scalar_lea.vmem [#allocation5], %s839_s4 }
  0x51   : > { %631 = dma.done.wait (%p1001_p6), %s173_s23, 256  }
  0x52   : > { %633 = vsyncadd (%p1001_p6), %s173_s23, 4294967040  ;;  %v210_v0 = vlaneseq  ;;  %v202_v3 = vld [vmem:[%s167_s19] sm:$0xff]  ;;  %v865_v5 = vld [vmem:[%s176_s29 + $0x8] sm:$0xff]  ;;  %s201_s20 = scalar_lea.vmem [#allocation7], %s839_s4  ;;  %s466_s6 = sshll.u32 %s697_s13, 8 }
  0x53   : > { %v863_v4 = vld [vmem:[%s176_s29] sm:$0xff]  ;;  %v226_v11 = vrot.slane %v865_v5, 1  ;;  %v245_v13 = vrot.slane %v865_v5, 2  ;;  %v264_v15 = vrot.slane %v865_v5, 3  ;;  %v283_v23 = vrot.slane %v865_v5, 7  ;;  %v892_v28 = vld [vmem:[%s167_s19 + $0x8] sm:$0xff]  ;;  %s946_s28 = scalar_lea.hbm %s992_s2, %s466_s6 }
  0x54   : > { %v853_v1 = vshrl.u32 %v210_v0, 7  ;;  %v206_v8 = vsub.f32 %v202_v3, %v863_v4  ;;  %v225_v10 = vrot.slane %v863_v4, 1  ;;  %v244_v12 = vrot.slane %v863_v4, 2  ;;  %s350_s5 = sshll.u32 %s201_s20, 4  ;;  %s337_s24 = scalar_lea.sflag [#allocation4], %s836_s30  ;;  %s941_s5 = int_to_ptr.vmem [resolvable:$true] %s350_s5 }
  0x55   : > { %v263_v14 = vrot.slane %v863_v4, 3  ;;  %v282_v19 = vrot.slane %v863_v4, 7  ;;  %v300_v26 = vrot.slane %v863_v4, 6  ;;  %v301_v27 = vrot.slane %v865_v5, 6  ;;  %s582_s13 = scalar_lea.vmem %s941_s5, 256  ;;  %p1002_p1 = scmp.ne.s32.totalorder %s997_s21, 0 }
  0x56   : > { %v215_v2 = vsub.s32 0, %v853_v1  ;;  %vm227_vm0 = vcmp.lt.s32.totalorder %v853_v1, 7  ;;  %vm246_vm1 = vcmp.lt.s32.totalorder %v853_v1, 6  ;;  %vm265_vm2 = vcmp.lt.s32.totalorder %v853_v1, 5  ;;  %p583_p13 = scmp.ne.s32.totalorder %s941_s5, %s582_s13  ;;  %s658_s26 = smov [#allocation7]  }
  0x57   : > { %vm284_vm3 = vcmp.lt.s32.totalorder %v853_v1, 1  ;;  %vm302_vm4 = vcmp.lt.s32.totalorder %v853_v1, 2  ;;  %vm320_vm5 = vcmp.lt.s32.totalorder %v853_v1, 3  ;;  %v869_v6 = vadd.s32 8, %v853_v1  ;;  %s586_s27 = sshll.u32 %s658_s26, 4  ;;  %s587_s27 = int_to_ptr.vmem [resolvable:$false] %s586_s27 }
  0x58   : > { %v219_v7 = vsub.s32 7, %v853_v1  ;;  %v216_v9 = vrot.slane %v863_v4, %v215_v2  ;;  %v208_v16 = vand.u32 2147483647, %v206_v8  ;;  %v228_v18 = vsel %vm227_vm0, %v225_v10, %v226_v11  ;;  %p584_p12 = pnand %p583_p13, %p1002_p1  ;;  %s588_s25 = scalar_lea.vmem %s587_s27, 512 }
  0x59   : > { %v232_v20 = vsub.f32 %v202_v3, %v228_v18  ;;  %v247_v21 = vsel %vm246_vm1, %v244_v12, %v245_v13  ;;  %v266_v22 = vsel %vm265_vm2, %v263_v14, %v264_v15  ;;  %vm231_vm6 = vcmp.ge.s32.totalorder %v869_v6, 15  ;;  %p589_p5 = scmp.lt.s32.totalorder %s941_s5, %s587_s27  ;;  %p590_p7 = scmp.lt.s32.totalorder %s588_s25, %s582_s13 }
  0x5a   : > { %v221_v17 = vsub.f32 %v202_v3, %v216_v9  ;;  %v251_v24 = vsub.f32 %v202_v3, %v247_v21  ;;  %v270_v25 = vsub.f32 %v202_v3, %v266_v22  ;;  %vm250_vm7 = vcmp.ge.s32.totalorder %v869_v6, 14  ;;  %p585_p10 = pneg %p584_p12 }
  0x5b   : > { %v236_v29 = vand.u32 2147483647, %v232_v20  ;;  %v286_v30 = vsel %vm284_vm3, %v283_v23, %v282_v19  ;;  %v318_v31 = vrot.slane %v863_v4, 5  ;;  %v319_v32 = vrot.slane %v865_v5, 5  ;;  %p591_p9 = por %p590_p7, %p589_p5 }
  0x5c   : > { %v255_v33 = vand.u32 2147483647, %v251_v24  ;;  %v274_v34 = vand.u32 2147483647, %v270_v25  ;;  %v288_v35 = vsub.f32 %v202_v3, %v286_v30  ;;  %v304_v36 = vsel %vm302_vm4, %v301_v27, %v300_v26 }
  0x5d   : > { %vm269_vm8 = vcmp.ge.s32.totalorder %v869_v6, 13  ;;  %vm238_vm9 = vcmp.lt.f32.partialorder %v236_v29, %v208_v16  ;;  %v306_v37 = vsub.f32 %v202_v3, %v304_v36  ;;  %v322_v38 = vsel %vm320_vm5, %v319_v32, %v318_v31  ;;  %p592_p11 = pnand %p591_p9, %p585_p10 }
  0x5e   : > { %v207_v39 = vsub.f32 %v892_v28, %v865_v5  ;;  %v240_v40 = vsel %vm238_vm9, %v232_v20, %v206_v8  ;;  %v242_v41 = vsel %vm238_vm9, %v236_v29, %v208_v16  ;;  %v290_v42 = vsel %vm284_vm3, %v221_v17, %v288_v35 }
  0x5f   : > { %v324_v43 = vsub.f32 %v202_v3, %v322_v38  ;;  %vm257_vm10 = vcmp.lt.f32.partialorder %v255_v33, %v242_v41  ;;  %v292_v44 = vand.u32 2147483647, %v290_v42  ;;  %v308_v45 = vsel %vm302_vm4, %v221_v17, %v306_v37 }
  0x60   : > { %v209_v46 = vand.u32 2147483647, %v207_v39  ;;  %v259_v47 = vsel %vm257_vm10, %v251_v24, %v240_v40  ;;  %v261_v48 = vsel %vm257_vm10, %v255_v33, %v242_v41  ;;  %v310_v49 = vand.u32 2147483647, %v308_v45 }
  0x61   : > { %v326_v50 = vsel %vm320_vm5, %v221_v17, %v324_v43  ;;  %vm276_vm11 = vcmp.lt.f32.partialorder %v274_v34, %v261_v48  ;;  %v220_v52 = vrot.slane %v865_v5, %v219_v7  ;;  %v229_v53 = vsel %vm227_vm0, %v226_v11, %v225_v10 }
  0x62   : > { %v328_v51 = vand.u32 2147483647, %v326_v50  ;;  %v278_v54 = vsel %vm276_vm11, %v270_v25, %v259_v47  ;;  %v280_v55 = vsel %vm276_vm11, %v274_v34, %v261_v48  ;;  %v233_v56 = vsub.f32 %v892_v28, %v229_v53 }
  0x63   : > { %v248_v57 = vsel %vm246_vm1, %v245_v13, %v244_v12  ;;  %vm294_vm12 = vcmp.lt.f32.partialorder %v292_v44, %v280_v55  ;;  %v224_v58 = vsub.f32 %v892_v28, %v220_v52  ;;  %v267_v60 = vsel %vm265_vm2, %v264_v15, %v263_v14 }
  0x64   : > { %v252_v59 = vsub.f32 %v892_v28, %v248_v57  ;;  %v296_v61 = vsel %vm294_vm12, %v290_v42, %v278_v54  ;;  %v298_v62 = vsel %vm294_vm12, %v292_v44, %v280_v55  ;;  %v271_v63 = vsub.f32 %v892_v28, %v267_v60 }
  0x65   : > { %v285_v0 = vsel %vm284_vm3, %v282_v19, %v283_v23  ;;  %vm312_vm13 = vcmp.lt.f32.partialorder %v310_v49, %v298_v62  ;;  %v235_v2 = vsel %vm231_vm6, %v224_v58, %v233_v56  ;;  %v303_v11 = vsel %vm302_vm4, %v300_v26, %v301_v27 }
  0x66   : > { %v254_v3 = vsel %vm250_vm7, %v224_v58, %v252_v59  ;;  %v289_v4 = vsub.f32 %v892_v28, %v285_v0  ;;  %v314_v5 = vsel %vm312_vm13, %v308_v45, %v296_v61  ;;  %v316_v7 = vsel %vm312_vm13, %v310_v49, %v298_v62 }
  0x67   : > { %v237_v8 = vand.u32 2147483647, %v235_v2  ;;  %v256_v9 = vand.u32 2147483647, %v254_v3  ;;  %vm330_vm14 = vcmp.lt.f32.partialorder %v328_v51, %v316_v7  ;;  %v273_v10 = vsel %vm269_vm8, %v224_v58, %v271_v63 }
  0x68   : > { %v332_v12 = vsel %vm330_vm14, %v326_v50, %v314_v5  ;;  %v275_v13 = vand.u32 2147483647, %v273_v10  ;;  %v307_v14 = vsub.f32 %v892_v28, %v303_v11  ;;  %v321_v17 = vsel %vm320_vm5, %v318_v31, %v319_v32 }
  0x69   : > { %vm239_vm15 = vcmp.lt.f32.partialorder %v237_v8, %v209_v46  ;;  %334 = vst [vmem:[%s201_s20] sm:$0xff] %v332_v12  ;;  %v293_v18 = vand.u32 2147483647, %v289_v4  ;;  %v325_v6 = vsub.f32 %v892_v28, %v321_v17 }
  0x6a   : > { %v241_v15 = vsel %vm239_vm15, %v235_v2, %v207_v39  ;;  %v243_v16 = vsel %vm239_vm15, %v237_v8, %v209_v46  ;;  %v311_v21 = vand.u32 2147483647, %v307_v14 }
  0x6b   : > { %vm258_vm0 = vcmp.lt.f32.partialorder %v256_v9, %v243_v16  ;;  %v329_v24 = vand.u32 2147483647, %v325_v6 }
  0x6c   : > { %v260_v19 = vsel %vm258_vm0, %v254_v3, %v241_v15  ;;  %v262_v20 = vsel %vm258_vm0, %v256_v9, %v243_v16 }
  0x6d   : > { %vm277_vm1 = vcmp.lt.f32.partialorder %v275_v13, %v262_v20 }
  0x6e   : > { %v279_v22 = vsel %vm277_vm1, %v273_v10, %v260_v19  ;;  %v281_v23 = vsel %vm277_vm1, %v275_v13, %v262_v20 }
  0x6f   : > { %vm295_vm2 = vcmp.lt.f32.partialorder %v293_v18, %v281_v23 }
  0x70   : > { %v297_v25 = vsel %vm295_vm2, %v289_v4, %v279_v22  ;;  %v299_v26 = vsel %vm295_vm2, %v293_v18, %v281_v23 }
  0x71   : > { %vm313_vm3 = vcmp.lt.f32.partialorder %v311_v21, %v299_v26 }
  0x72   : > { %v315_v1 = vsel %vm313_vm3, %v307_v14, %v297_v25  ;;  %v317_v27 = vsel %vm313_vm3, %v311_v21, %v299_v26 }
  0x73   : > { %vm331_vm4 = vcmp.lt.f32.partialorder %v329_v24, %v317_v27 }
  0x74   : > { %v333_v28 = vsel %vm331_vm4, %v325_v6, %v315_v1 }
  0x75   : > { %335 = vst [vmem:[%s201_s20 + $0x8] sm:$0xff] %v333_v28 }
  0x76   : > { %595 = shalt.err (!%p592_p11)
}
  0x77   : > { %s596_s7 = scalar_lea.hbm %s946_s28, 256  ;;  %s600_s4 = scalar_lea.hbm %s992_s2, 512 }
  0x78   : > { %p597_p3 = scmp.ne.s32.totalorder %s946_s28, %s596_s7  ;;  %p601_p2 = scmp.lt.u32.totalorder %s946_s28, %s992_s2 }
  0x79   : > { %p602_p4 = scmp.lt.u32.totalorder %s600_s4, %s596_s7  ;;  %p604_p13 = scmp.lt.u32.totalorder %s596_s7, %s946_s28 }
  0x7a   : > { %p598_p8 = pnand %p597_p3, %p1002_p1 }
  0x7b   : > { %p603_p6 = por %p602_p4, %p601_p2 }
  0x7c   : > { %p599_p0 = pneg %p598_p8 }
  0x7d   : > { %p605_p12 = por %p604_p13, %p603_p6 }
  0x7f   : > { %p606_p10 = pnand %p605_p12, %p599_p0 }
  0x81   : > { %609 = shalt.err (!%p606_p10)
}
  0x82   : > { %s659_s23 = smov 128   ;;  %s660_s29 = smov 8  }
  0x83   : > { %471 = dma.vmem_to_hbm [thread:$0]  (%p1002_p1), %s941_s5, 256, %s946_s28, %s337_s24, %s659_s23, %s659_s23, %s660_s29  }
  0x84 PF: > { %s365_s20 = sand.u32 1, %s640_s9   ;;  %p1003_p5 = scmp.ne.s32.totalorder %s998_s22, 0 }
  0x85   : > { %p1004_p7 = scmp.ge.s32.totalorder %s652_s12, 2  ;;  %s366_s6 = scalar_lea.sflag [#allocation4], %s365_s20 }
  0x87   : > { %p481_p9 = pnand %p1004_p7, %p1003_p5 }
  0x89   : > { %635 = dma.done.wait (!%p481_p9), %s366_s6, 256  }
  0x8a   : > { %637 = vsyncadd (!%p481_p9), %s366_s6, 4294967040  ;;  %p18_p11 = scmp.ge.s32.totalorder %s701_s15, 4   ;;  %s1005_s9 = smov %s644_s10 }
  0x8b   : > { %s1006_s10 = smov %s648_s11  ;;  %s1007_s11 = smov %s713_s18 }
  0x8c   : > { %s1008_s12 = smov %s701_s15  ;;  %20 = sbr.rel (!%p18_p11) target bundleno = 7 (0x7), region = 86 }
  0x93   :  { %371 = vsyncpa [#allocation3], 1 }
  0x94   :  { %373 = vsyncpa [#allocation3 + $0x1], 1 }
  0x95   :  { %374 = vsyncpa [#allocation6], 1 }
  0x96   :  { %376 = vsyncpa [#allocation6 + $0x1], 1 }
  0x97   :  { %377 = vsyncpa [#allocation4], 1 }
  0x98   :  { %379 = vsyncpa [#allocation4 + $0x1], 1 }

</bundles_post_ra>
